<compile_context>
chip_gen: v7x
topology: tpu7x:2x2x1
jax: 0.10.0
libtpu: 0.0.40
codegen_flags: <defaults>
</compile_context>

<pallas_src>
import jax
import jax.numpy as jnp
from jax import lax
from jax.experimental import pallas as pl
from jax.experimental.pallas import tpu as pltpu


# ----------------------------------------------------------------------------
# Pallas kernel: fused DoubleConv on the whole batch, one invocation.
# ----------------------------------------------------------------------------
def _up_double_conv_kernel(x_ref, mask_ref, w1_ref, b1_ref, w2_ref, b2_ref,
                           o_ref, mid_ref):
    # x_ref   : (M+2, Wp*Cin)   bf16; rows 1..M are the stacked, zero-padded
    #                           padded-grid activations (M = N*Hp); rows 0 and
    #                           M+1 are extra zero rows so the dy-shifted views
    #                           below stay in range.
    # mask_ref: (M, 1)          f32; 1.0 on interior padded rows, 0.0 on halo
    #                           rows (also wipes cross-batch-block garbage).
    # w1_ref  : (3*Wp*Cin,  Wp*Cmid) bf16 block-Toeplitz conv1 weights (dy-major).
    # b1_ref  : (1, Wp*Cmid)    f32 conv1 bias, zero on halo columns.
    # w2_ref  : (3*Wp*Cmid, W*Cout)  bf16 block-Toeplitz conv2 weights (dy-major).
    # b2_ref  : (1, W*Cout)     f32 conv2 bias.
    # o_ref   : (M, W*Cout)     f32; rows with block-relative index >= H are
    #                           garbage and sliced off in the wrapper.
    # mid_ref : (M+2, Wp*Cmid)  bf16 scratch for the conv1 activation.
    M = o_ref.shape[0]
    K1 = w1_ref.shape[0] // 3
    K2 = w2_ref.shape[0] // 3
    tail = mid_ref.shape[0] - M

    # ---- conv1: 3 accumulating MXU dots (dy = 0,1,2); the dy row shift is a
    #      static, row-shifted view of the row-padded input ref.
    acc = jnp.dot(x_ref[0:M, :], w1_ref[0:K1, :],
                  preferred_element_type=jnp.float32)
    acc += jnp.dot(x_ref[1:M + 1, :], w1_ref[K1:2 * K1, :],
                   preferred_element_type=jnp.float32)
    acc += jnp.dot(x_ref[2:M + 2, :], w1_ref[2 * K1:3 * K1, :],
                   preferred_element_type=jnp.float32)
    # halo columns are exact zeros by construction of w1big/b1big; halo rows
    # (and cross-block roll-over garbage) are zeroed by the row mask.
    mid = jnp.maximum(acc + b1_ref[...], 0.0) * mask_ref[...]
    midb = mid.astype(jnp.bfloat16)
    mid_ref[0:M, :] = midb
    mid_ref[M:, :] = jnp.zeros((tail, K2), jnp.bfloat16)

    # ---- conv2: same structure; dy shifts read from the mid scratch ref.
    acc2 = jnp.dot(midb, w2_ref[0:K2, :],
                   preferred_element_type=jnp.float32)
    acc2 += jnp.dot(mid_ref[1:M + 1, :], w2_ref[K2:2 * K2, :],
                    preferred_element_type=jnp.float32)
    acc2 += jnp.dot(mid_ref[2:M + 2, :], w2_ref[2 * K2:3 * K2, :],
                    preferred_element_type=jnp.float32)
    o_ref[...] = jnp.maximum(acc2 + b2_ref[...], 0.0)   # lane-dense f32 store


# ----------------------------------------------------------------------------
# Host-side weight packing (done ONCE, outside the forward path).
# Folds the dx taps + channels of a 3x3 conv into a block-Toeplitz matrix that
# acts on lane-packed rows (W*C on the lane axis); dy blocks stacked along K.
# ----------------------------------------------------------------------------
def _toeplitz_conv_weight(w, W, pad_out, out_dtype):
    """w: (3,3,Cin,Cout) HWIO.  Returns (3*(W+2)*Cin, (W+2*pad_out)*Cout)."""
    Kh, Kw, Cin, Cout = w.shape
    Wp = W + 2
    Wo = W + 2 * pad_out
    blocks = []
    for dy in range(Kh):
        blk = jnp.zeros((Wp, Cin, Wo, Cout), jnp.float32)
        for dx in range(Kw):
            eye = jnp.zeros((Wp, Wo), jnp.float32)
            xi = jnp.arange(W) + dx          # input column (padded frame)
            xo = jnp.arange(W) + pad_out     # output column
            eye = eye.at[xi, xo].set(1.0)
            blk = blk + eye[:, None, :, None] * \
                w[dy, dx].astype(jnp.float32)[None, :, None, :]
        blocks.append(blk.reshape(Wp * Cin, Wo * Cout))
    return jnp.concatenate(blocks, axis=0).astype(out_dtype)


def _packed_bias(b, W, pad_out):
    """b: (Cout,) -> (1, (W+2*pad_out)*Cout), zero on halo columns."""
    b = b.reshape(-1).astype(jnp.float32)
    Cout = b.shape[0]
    row = jnp.tile(b.reshape(1, Cout), (W, 1)).reshape(W * Cout)
    row = jnp.pad(row, (pad_out * Cout, pad_out * Cout))
    return row.reshape(1, -1)


def pack_up_layer_params(params, W):
    """Pack (w1, b1, w2, b2) for the kernel; call once per weight update."""
    w1, b1, w2, b2 = params
    w1big = _toeplitz_conv_weight(w1, W, pad_out=1, out_dtype=jnp.bfloat16)
    w2big = _toeplitz_conv_weight(w2, W, pad_out=0, out_dtype=jnp.bfloat16)
    b1big = _packed_bias(b1, W, pad_out=1)
    b2big = _packed_bias(b2, W, pad_out=0)
    return (w1big, b1big, w2big, b2big)


# ----------------------------------------------------------------------------
# JAX glue: bilinear x2 upsample (align_corners=True).
# ----------------------------------------------------------------------------
def bilinear_up2_align_corners(x_nhwc):
    N, H, W, C = x_nhwc.shape
    Ho, Wo = 2 * H, 2 * W

    def coords(insz, outsz):
        if insz == 1:
            z = jnp.zeros((outsz,), jnp.int32)
            return z, z, jnp.zeros((outsz,), jnp.float32)
        src = jnp.arange(outsz, dtype=jnp.float32) * (insz - 1) / (outsz - 1)
        i0 = jnp.clip(jnp.floor(src).astype(jnp.int32), 0, insz - 1)
        i1 = jnp.minimum(i0 + 1, insz - 1)
        return i0, i1, src - i0.astype(jnp.float32)

    y0, y1, fy = coords(H, Ho)
    x0, x1, fx = coords(W, Wo)
    top, bot = x_nhwc[:, y0, :, :], x_nhwc[:, y1, :, :]
    rows = top * (1.0 - fy[None, :, None, None]) + bot * fy[None, :, None, None]
    left, right = rows[:, :, x0, :], rows[:, :, x1, :]
    return left * (1.0 - fx[None, None, :, None]) + right * fx[None, None, :, None]


# ----------------------------------------------------------------------------
# UpLayer forward (bilinear=True).  NCHW in/out to match PyTorch.
# ----------------------------------------------------------------------------
def up_layer_forward(x1_nchw, x2_nchw, packed):
    w1big, b1big, w2big, b2big = packed
    x1 = jnp.transpose(x1_nchw, (0, 2, 3, 1)).astype(jnp.float32)  # NHWC
    x2 = jnp.transpose(x2_nchw, (0, 2, 3, 1)).astype(jnp.float32)

    x1 = bilinear_up2_align_corners(x1)

    N, H, W, Ca = x2.shape
    diffY = H - x1.shape[1]
    diffX = W - x1.shape[2]

    # fold the centering pad and the 1-px conv halo into a single pad each
    x1p = jnp.pad(x1, ((0, 0),
                       (1 + diffY // 2, 1 + diffY - diffY // 2),
                       (1 + diffX // 2, 1 + diffX - diffX // 2),
                       (0, 0)))
    x2p = jnp.pad(x2, ((0, 0), (1, 1), (1, 1), (0, 0)))

    Hp, Wp = H + 2, W + 2
    # channel concat == torch.cat([x2, x1], dim=1); lane-pack as (Hp, Wp*Cin),
    # fold batch into rows, pre-cast to bf16, add one zero row top & bottom so
    # the kernel's dy-shifted views stay in range.
    xcat = jnp.concatenate([x2p, x1p], axis=-1)            # (N, Hp, Wp, Cin)
    Cin = xcat.shape[-1]
    M = N * Hp
    xab = xcat.reshape(M, Wp * Cin).astype(jnp.bfloat16)
    xab = jnp.pad(xab, ((1, 1), (0, 0)))                   # (M+2, Wp*Cin)

    K1 = Wp * Cin
    Cmid = b1big.shape[1] // Wp
    Cout = b2big.shape[1] // W
    K2 = Wp * Cmid

    # interior-row mask on the padded row grid (also kills cross-batch-block
    # contamination from the shifted views).
    r = jnp.arange(M, dtype=jnp.int32) % Hp
    rowmask = ((r >= 1) & (r <= H)).astype(jnp.float32).reshape(M, 1)

    flops = 2 * M * 3 * (K1 * (Wp * Cmid) + K2 * (W * Cout))
    bytes_accessed = (xab.size * 2 + rowmask.size * 4 +
                      w1big.size * 2 + b1big.size * 4 +
                      w2big.size * 2 + b2big.size * 4 +
                      M * W * Cout * 4)

    out_flat = pl.pallas_call(
        _up_double_conv_kernel,
        out_shape=jax.ShapeDtypeStruct((M, W * Cout), jnp.float32),
        scratch_shapes=[pltpu.VMEM((M + 2, K2), jnp.bfloat16)],
        cost_estimate=pl.CostEstimate(flops=flops, transcendentals=0,
                                      bytes_accessed=bytes_accessed),
    )(xab, rowmask, w1big, b1big, w2big, b2big)

    # drop the per-block garbage rows (block-relative rows H, H+1)
    y = out_flat.reshape(N, Hp, W * Cout)[:, :H, :]
    y = y.reshape(N, H, W, Cout)
    return jnp.transpose(y, (0, 3, 1, 2))      # back to NCHW


# ----------------------------------------------------------------------------
# Pure-JAX reference (full-precision) for correctness checking.
# ----------------------------------------------------------------------------
def _conv3x3_ref(x_nhwc, w, b):
    y = lax.conv_general_dilated(
        x_nhwc, w, window_strides=(1, 1), padding=((1, 1), (1, 1)),
        dimension_numbers=("NHWC", "HWIO", "NHWC"))
    return y + b.reshape(1, 1, 1, -1)


def up_layer_forward_ref(x1_nchw, x2_nchw, params):
    x1 = jnp.transpose(x1_nchw, (0, 2, 3, 1)).astype(jnp.float32)
    x2 = jnp.transpose(x2_nchw, (0, 2, 3, 1)).astype(jnp.float32)
    x1 = bilinear_up2_align_corners(x1)
    diffY = x2.shape[1] - x1.shape[1]
    diffX = x2.shape[2] - x1.shape[2]
    x1 = jnp.pad(x1, ((0, 0),
                      (diffY // 2, diffY - diffY // 2),
                      (diffX // 2, diffX - diffX // 2),
                      (0, 0)))
    x = jnp.concatenate([x2, x1], axis=-1)
    w1, b1, w2, b2 = params
    h = jnp.maximum(_conv3x3_ref(x, w1, b1), 0.0)
    y = jnp.maximum(_conv3x3_ref(h, w2, b2), 0.0)
    return jnp.transpose(y, (0, 3, 1, 2))


# ----------------------------------------------------------------------------
if __name__ == "__main__":
    # UpLayer(in_ch=8, out_ch=8): x1 has in_ch//2=4 channels at 8x8,
    # x2 (skip) has 4 channels at 16x16.
    IN_CH, OUT_CH = 8, 8
    N, H1, W1 = 2, 8, 8

    key = jax.random.PRNGKey(0)
    k1, k2, k3, k4, k5, k6 = jax.random.split(key, 6)

    x1 = jax.random.normal(k1, (N, IN_CH // 2, H1, W1), dtype=jnp.float32)
    x2 = jax.random.normal(k2, (N, IN_CH // 2, 2 * H1, 2 * W1),
                           dtype=jnp.float32)

    w1 = 0.1 * jax.random.normal(k3, (3, 3, IN_CH, OUT_CH), dtype=jnp.float32)
    b1 = 0.05 * jax.random.normal(k4, (OUT_CH,), dtype=jnp.float32)
    w2 = 0.1 * jax.random.normal(k5, (3, 3, OUT_CH, OUT_CH), dtype=jnp.float32)
    b2 = 0.05 * jax.random.normal(k6, (OUT_CH,), dtype=jnp.float32)
    params = (w1, b1, w2, b2)

    # weight packing hoisted out of the forward path (done once per params)
    packed = pack_up_layer_params(params, 2 * W1)

    fwd = jax.jit(up_layer_forward)
    out = jax.block_until_ready(fwd(x1, x2, packed))
    ref = jax.block_until_ready(up_layer_forward_ref(x1, x2, params))

    assert out.shape == (N, OUT_CH, 2 * H1, 2 * W1), out.shape
    max_err = float(jnp.max(jnp.abs(out - ref)))
    # bf16 MXU operands with f32 accumulation: loosened tolerance vs f32 ref.
    assert max_err < 5e-2, max_err
    print("KERNEL_OK")
</pallas_src>

<mosaic_0001>
module attributes {stable_mosaic.version = 11 : i64} {
  func.func @_up_double_conv_kernel(%arg0: memref<38x144xbf16, #tpu.memory_space<vmem>>, %arg1: memref<36x1xf32, #tpu.memory_space<vmem>>, %arg2: memref<432x144xbf16, #tpu.memory_space<vmem>>, %arg3: memref<1x144xf32, #tpu.memory_space<vmem>>, %arg4: memref<432x128xbf16, #tpu.memory_space<vmem>>, %arg5: memref<1x128xf32, #tpu.memory_space<vmem>>, %arg6: memref<36x128xf32, #tpu.memory_space<vmem>>, %arg7: memref<38x144xbf16, #tpu.memory_space<vmem>>) attributes {dimension_semantics = [], scalar_prefetch = 0 : i64, scratch_operands = 1 : i64, tpu.core_type = #tpu.core_type<tc>} {
    %c0 = arith.constant 0 : index
    %c0_0 = arith.constant 0 : index
    %0 = vector.load %arg0[%c0, %c0_0] : memref<38x144xbf16, #tpu.memory_space<vmem>>, vector<36x144xbf16>
    %c0_1 = arith.constant 0 : index
    %c0_2 = arith.constant 0 : index
    %1 = vector.load %arg2[%c0_1, %c0_2] : memref<432x144xbf16, #tpu.memory_space<vmem>>, vector<144x144xbf16>
    %cst = arith.constant dense<0.000000e+00> : vector<36x144xf32>
    %2 = tpu.matmul %0, %1, %cst {dimension_numbers = #tpu.dot_dimension_numbers<[1], [0], [0], [1], [0, 0, 1, 1], [], []>} : vector<36x144xbf16>, vector<144x144xbf16>, vector<36x144xf32> -> vector<36x144xf32>
    %c1 = arith.constant 1 : index
    %c0_3 = arith.constant 0 : index
    %3 = vector.load %arg0[%c1, %c0_3] : memref<38x144xbf16, #tpu.memory_space<vmem>>, vector<36x144xbf16>
    %c144 = arith.constant 144 : index
    %c0_4 = arith.constant 0 : index
    %4 = vector.load %arg2[%c144, %c0_4] : memref<432x144xbf16, #tpu.memory_space<vmem>>, vector<144x144xbf16>
    %cst_5 = arith.constant dense<0.000000e+00> : vector<36x144xf32>
    %5 = tpu.matmul %3, %4, %cst_5 {dimension_numbers = #tpu.dot_dimension_numbers<[1], [0], [0], [1], [0, 0, 1, 1], [], []>} : vector<36x144xbf16>, vector<144x144xbf16>, vector<36x144xf32> -> vector<36x144xf32>
    %6 = arith.addf %2, %5 : vector<36x144xf32>
    %c2 = arith.constant 2 : index
    %c0_6 = arith.constant 0 : index
    %7 = vector.load %arg0[%c2, %c0_6] : memref<38x144xbf16, #tpu.memory_space<vmem>>, vector<36x144xbf16>
    %c288 = arith.constant 288 : index
    %c0_7 = arith.constant 0 : index
    %8 = vector.load %arg2[%c288, %c0_7] : memref<432x144xbf16, #tpu.memory_space<vmem>>, vector<144x144xbf16>
    %cst_8 = arith.constant dense<0.000000e+00> : vector<36x144xf32>
    %9 = tpu.matmul %7, %8, %cst_8 {dimension_numbers = #tpu.dot_dimension_numbers<[1], [0], [0], [1], [0, 0, 1, 1], [], []>} : vector<36x144xbf16>, vector<144x144xbf16>, vector<36x144xf32> -> vector<36x144xf32>
    %10 = arith.addf %6, %9 : vector<36x144xf32>
    %c0_9 = arith.constant 0 : index
    %c0_10 = arith.constant 0 : index
    %11 = vector.load %arg3[%c0_9, %c0_10] : memref<1x144xf32, #tpu.memory_space<vmem>>, vector<1x144xf32>
    %12 = vector.broadcast %11 : vector<1x144xf32> to vector<36x144xf32>
    %13 = arith.addf %10, %12 : vector<36x144xf32>
    %cst_11 = arith.constant 0.000000e+00 : f32
    %14 = vector.broadcast %cst_11 : f32 to vector<36x144xf32>
    %15 = arith.maximumf %13, %14 : vector<36x144xf32>
    %c0_12 = arith.constant 0 : index
    %c0_13 = arith.constant 0 : index
    %16 = vector.load %arg1[%c0_12, %c0_13] : memref<36x1xf32, #tpu.memory_space<vmem>>, vector<36x1xf32>
    %17 = vector.broadcast %16 : vector<36x1xf32> to vector<36x144xf32>
    %18 = arith.mulf %15, %17 : vector<36x144xf32>
    %19 = arith.truncf %18 : vector<36x144xf32> to vector<36x144xbf16>
    %c0_14 = arith.constant 0 : index
    %c0_15 = arith.constant 0 : index
    %20 = vector.load %arg7[%c0_14, %c0_15] : memref<38x144xbf16, #tpu.memory_space<vmem>>, vector<36x144xbf16>
    tpu.vector_store %arg7[%c0_14, %c0_15], %19 {strides = array<i32>} : memref<38x144xbf16, #tpu.memory_space<vmem>>, vector<36x144xbf16>,
    %cst_16 = arith.constant 0.000000e+00 : bf16
    %21 = vector.broadcast %cst_16 : bf16 to vector<2x144xbf16>
    %c36 = arith.constant 36 : index
    %c0_17 = arith.constant 0 : index
    %22 = vector.load %arg7[%c36, %c0_17] : memref<38x144xbf16, #tpu.memory_space<vmem>>, vector<2x144xbf16>
    tpu.vector_store %arg7[%c36, %c0_17], %21 {strides = array<i32>} : memref<38x144xbf16, #tpu.memory_space<vmem>>, vector<2x144xbf16>,
    %c0_18 = arith.constant 0 : index
    %c0_19 = arith.constant 0 : index
    %23 = vector.load %arg4[%c0_18, %c0_19] : memref<432x128xbf16, #tpu.memory_space<vmem>>, vector<144x128xbf16>
    %cst_20 = arith.constant dense<0.000000e+00> : vector<36x128xf32>
    %24 = tpu.matmul %19, %23, %cst_20 {dimension_numbers = #tpu.dot_dimension_numbers<[1], [0], [0], [1], [0, 0, 1, 1], [], []>} : vector<36x144xbf16>, vector<144x128xbf16>, vector<36x128xf32> -> vector<36x128xf32>
    %c1_21 = arith.constant 1 : index
    %c0_22 = arith.constant 0 : index
    %25 = vector.load %arg7[%c1_21, %c0_22] : memref<38x144xbf16, #tpu.memory_space<vmem>>, vector<36x144xbf16>
    %c144_23 = arith.constant 144 : index
    %c0_24 = arith.constant 0 : index
    %26 = vector.load %arg4[%c144_23, %c0_24] : memref<432x128xbf16, #tpu.memory_space<vmem>>, vector<144x128xbf16>
    %cst_25 = arith.constant dense<0.000000e+00> : vector<36x128xf32>
    %27 = tpu.matmul %25, %26, %cst_25 {dimension_numbers = #tpu.dot_dimension_numbers<[1], [0], [0], [1], [0, 0, 1, 1], [], []>} : vector<36x144xbf16>, vector<144x128xbf16>, vector<36x128xf32> -> vector<36x128xf32>
    %28 = arith.addf %24, %27 : vector<36x128xf32>
    %c2_26 = arith.constant 2 : index
    %c0_27 = arith.constant 0 : index
    %29 = vector.load %arg7[%c2_26, %c0_27] : memref<38x144xbf16, #tpu.memory_space<vmem>>, vector<36x144xbf16>
    %c288_28 = arith.constant 288 : index
    %c0_29 = arith.constant 0 : index
    %30 = vector.load %arg4[%c288_28, %c0_29] : memref<432x128xbf16, #tpu.memory_space<vmem>>, vector<144x128xbf16>
    %cst_30 = arith.constant dense<0.000000e+00> : vector<36x128xf32>
    %31 = tpu.matmul %29, %30, %cst_30 {dimension_numbers = #tpu.dot_dimension_numbers<[1], [0], [0], [1], [0, 0, 1, 1], [], []>} : vector<36x144xbf16>, vector<144x128xbf16>, vector<36x128xf32> -> vector<36x128xf32>
    %32 = arith.addf %28, %31 : vector<36x128xf32>
    %c0_31 = arith.constant 0 : index
    %c0_32 = arith.constant 0 : index
    %33 = vector.load %arg5[%c0_31, %c0_32] : memref<1x128xf32, #tpu.memory_space<vmem>>, vector<1x128xf32>
    %34 = vector.broadcast %33 : vector<1x128xf32> to vector<36x128xf32>
    %35 = arith.addf %32, %34 : vector<36x128xf32>
    %cst_33 = arith.constant 0.000000e+00 : f32
    %36 = vector.broadcast %cst_33 : f32 to vector<36x128xf32>
    %37 = arith.maximumf %35, %36 : vector<36x128xf32>
    %c0_34 = arith.constant 0 : index
    %c0_35 = arith.constant 0 : index
    %38 = vector.load %arg6[%c0_34, %c0_35] : memref<36x128xf32, #tpu.memory_space<vmem>>, vector<36x128xf32>
    tpu.vector_store %arg6[%c0_34, %c0_35], %37 {strides = array<i32>} : memref<36x128xf32, #tpu.memory_space<vmem>>, vector<36x128xf32>,
    return
  }
}

</mosaic_0001>

<bundles_post_ra>
// kernel: up_layer_forward.1
= control target key start
LH: loop header
LB: loop body
LE: loop exit
PB: predicated region body
PF: predicated region fallthrough
CT: control target
= control target key end

     0   :  { %v1600_v1 = vmov 0   ;;  %vm87_vm0 = vsmask.f32 7424  ;;  %vm227_vm1 = vcmask 130048   ;;  %vm488_vm2 = vcmask 1046528   ;;  %s2159_s2 = inlined_call_operand.vmem [shape: bf16[432,144], index: 2, kind: input, shape index: {}]   ;;  %s2160_s0 = inlined_call_operand.vmem [shape: bf16[38,144], index: 0, kind: input, shape index: {}]   ;;  %s2161_s1 = inlined_call_operand.vmem [shape: f32[36,1], index: 1, kind: input, shape index: {}]   ;;  %s2162_s4 = inlined_call_operand.vmem [shape: bf16[432,128], index: 4, kind: input, shape index: {}]   ;;  %s2163_s3 = inlined_call_operand.vmem [shape: f32[1,144], index: 3, kind: input, shape index: {}]   ;;  %s2164_s5 = inlined_call_operand.vmem [shape: f32[1,128], index: 5, kind: input, shape index: {}]   ;;  %s2165_s6 = inlined_call_operand.vmem [shape: f32[36,128], index: 6, kind: output, shape index: {}]  }
   0x1   :  { %v1474_v0 = vld [vmem:[%s2159_s2 + $0x94] ss:$8 sps:$4 sm:$0xff]   ;;  %1472 = vset.pattern.permute.xlu0 %v1600_v1  ;;  %1473 = vset.pattern.permute.xlu1 %v1600_v1  ;;  %v1476_v2 = vld [vmem:[%s2159_s2 + $0x90] ss:$8 sps:$4 sm:$0xff]   ;;  %v1477_v3 = vld [vmem:[%s2159_s2 + $0xa4] ss:$8 sps:$4 sm:$0xff]  }
   0x2   :  { %965 = vmatprep.subr.bf16.mxu1 %v1600_v1  ;;  %237 = vmatprep.subr.bf16.mxu0 %v1474_v0  ;;  %v1479_v4 = vld [vmem:[%s2159_s2 + $0xa0] ss:$8 sps:$4 sm:$0xff]   ;;  %v1480_v5 = vld [vmem:[%s2159_s2 + $0xb4] ss:$8 sps:$4 sm:$0xff]   ;;  %v1482_v6 = vld [vmem:[%s2159_s2 + $0xb0] ss:$8 sps:$4 sm:$0xff]  }
   0x3   :  { %238 = vmatpush1.bf16.msra.mxu0 %v1476_v2  ;;  %v1483_v7 = vld [vmem:[%s2159_s2 + $0xc4] ss:$8 sps:$4 sm:$0xff]   ;;  %v1485_v8 = vld [vmem:[%s2159_s2 + $0xc0] ss:$8 sps:$4 sm:$0xff]   ;;  %v1486_v9 = vld [vmem:[%s2159_s2 + $0xd4] ss:$8 sps:$4 sm:$0xff]  }
   0x4   :  { %239 = vmatprep.subr.bf16.mxu0 %v1477_v3  ;;  %v24_v10 = vld [vmem:[%s2160_s0] sm:$0xff]  ;;  %v1672_v11 = vld [vmem:[%s2160_s0 + $0x8] sm:$0xff]  ;;  %v1680_v13 = vld [vmem:[%s2160_s0 + $0x14] ss:$8 sps:$4 sm:$0xff]   ;;  %vm787_vm3 = vcmask 1042434   ;;  %vm788_vm4 = vcmask 129030  }
   0x5   :  { %v1675_v12 = vcombine.high %v24_v10, %v1672_v11  ;;  %v1488_v14 = vld [vmem:[%s2159_s2 + $0xd0] ss:$8 sps:$4 sm:$0xff]   ;;  %v108_v17 = vshll.u32 %v1680_v13, 16  ;;  %v1489_v18 = vld [vmem:[%s2159_s2 + $0xe4] ss:$8 sps:$4 sm:$0xff]   ;;  %v1695_v23 = vcombine.low %v24_v10, %v1672_v11  ;;  %v493_v36 = vrot.slane %v1680_v13, 1  ;;  %vm789_vm5 = vmor %vm788_vm4, %vm787_vm3 }
   0x6   :  { %v1491_v21 = vld [vmem:[%s2159_s2 + $0xe0] ss:$8 sps:$4 sm:$0xff]   ;;  %v1492_v24 = vld [vmem:[%s2159_s2 + $0xf4] ss:$8 sps:$4 sm:$0xff]   ;;  %v1494_v27 = vld [vmem:[%s2159_s2 + $0xf0] ss:$8 sps:$4 sm:$0xff]  }
   0x7   :  { %240 = vmatpush1.bf16.msra.mxu0 %v1479_v4  ;;  %v101_v15 = vshrl.u32 %v1675_v12, 16  ;;  %v103_v16 = vshll.u32 %v1675_v12, 16  ;;  %v110_v20 = vrot.slane %v108_v17, 1  ;;  %v47_v26 = vld [vmem:[%s2160_s0 + $0x20] sm:$0x77]  ;;  %v91_v29 = vshll.u32 %v1695_v23, 16 }
   0x8   :  { %241 = vmatprep.subr.bf16.mxu0 %v1480_v5  ;;  %v1711_v28 = vld [vmem:[%s2160_s0 + $0x10] ss:$8 sps:$4 sm:$0xff]   ;;  %v1495_v30 = vld [vmem:[%s2159_s2 + $0x104] ss:$8 sps:$4 sm:$0xff]   ;;  %v1717_v31 = vcombine.high %v47_v26, %v47_v26  ;;  %v1497_v32 = vld [vmem:[%s2159_s2 + $0x100] ss:$8 sps:$4 sm:$0xff]   ;;  %v1739_v45 = vcombine.low %v47_v26, %v47_v26 }
   0x9   :  { %v105_v19 = vrot.slane %v103_v16, 1  ;;  %v89_v33 = vshrl.u32 %v1695_v23, 16  ;;  %v93_v34 = vrot.slane %v91_v29, 1  ;;  %v96_v35 = vshll.u32 %v1711_v28, 16  ;;  %v1498_v38 = vld [vmem:[%s2159_s2 + $0x114] ss:$8 sps:$4 sm:$0xff]  }
   0xa   :  { %v497_v37 = vrot.slane %v1717_v31, 1  ;;  %v120_v39 = vshrl.u32 %v1680_v13, 16  ;;  %v124_v40 = vshll.u32 %v1717_v31, 16  ;;  %v1500_v42 = vld [vmem:[%s2159_s2 + $0x110] ss:$8 sps:$4 sm:$0xff]   ;;  %v112_v51 = vshrl.u32 %v1711_v28, 16 }
   0xb   :  { %242 = vmatpush1.bf16.msra.mxu0 %v1482_v6  ;;  %v106_v22 = vor.u32 %v105_v19, %v101_v15  ;;  %v94_v43 = vor.u32 %v93_v34, %v89_v33  ;;  %v98_v44 = vrot.slane %v96_v35, 1  ;;  %v1506_v47 = vld [vmem:[%s2159_s2 + $0x4] ss:$8 sps:$4 sm:$0xff]   ;;  %v1504_v49 = vld [vmem:[%s2159_s2] ss:$8 sps:$4 sm:$0xff]   ;;  %v116_v52 = vshll.u32 %v1739_v45, 16 }
   0xc   :  { %243 = vmatprep.subr.bf16.mxu0 %v1483_v7  ;;  %v1734_v41 = vsel %vm488_vm2, %v493_v36, %v497_v37  ;;  %v122_v46 = vor.u32 %v120_v39, %v110_v20  ;;  %v126_v48 = vrot.slane %v124_v40, 1  ;;  %v1511_v53 = vld [vmem:[%s2159_s2 + $0x14] ss:$8 sps:$4 sm:$0xff]   ;;  %v1509_v55 = vld [vmem:[%s2159_s2 + $0x10] ss:$8 sps:$4 sm:$0xff]   ;;  %v131_v58 = vshrl.u32 %v1717_v31, 16 }
   0xd   :  { %v111_v25 = vsel %vm87_vm0, %v106_v22, %v110_v20  ;;  %v99_v50 = vsel %vm87_vm0, %v94_v43, %v98_v44  ;;  %v114_v56 = vor.u32 %v112_v51, %v98_v44  ;;  %v118_v57 = vrot.slane %v116_v52, 1  ;;  %v1514_v59 = vld [vmem:[%s2159_s2 + $0x24] ss:$8 sps:$4 sm:$0xff]   ;;  %v706_v0 = vld [vmem:[%s2161_s1 + $0x10] sm:$0xff]  ;;  %v1512_v3 = vld [vmem:[%s2159_s2 + $0x20] ss:$8 sps:$4 sm:$0xff]  }
   0xe   :  { %1351 = vmatprep.mubr.msk.bf16.mxu0 %vm227_vm1, %v111_v25  ;;  %v127_v54 = vsel %vm87_vm0, %v122_v46, %v126_v48  ;;  %v1765_v60 = vld [vmem:[%s2160_s0] sm:$0xee]  ;;  %v705_v2 = vld [vmem:[%s2161_s1 + $0x8] sm:$0xff]  ;;  %721 = vperm.xlu1 %1473, %v706_v0   ;;  %v133_v5 = vor.u32 %v131_v58, %v126_v48  ;;  %v707_v7 = vld [vmem:[%s2161_s1 + $0x18] sm:$0xff]  ;;  %v128_v10 = vshrl.u32 %v1739_v45, 16  ;;  %v490_v52 = vrot.slane %v1711_v28, 1 }
   0xf   :  { %244 = vmatpush1.bf16.msra.mxu0 %v1485_v8  ;;  %v704_v61 = vld [vmem:[%s2161_s1] sm:$0xff]  ;;  %v1377_v62 = vcombine.low %v1765_v60, %v1672_v11  ;;  %v1378_v63 = vcombine.high %v1765_v60, %v1672_v11  ;;  %v119_v4 = vsel %vm87_vm0, %v114_v56, %v118_v57  ;;  %v1517_v8 = vld [vmem:[%s2159_s2 + $0x34] ss:$8 sps:$4 sm:$0xff]   ;;  %v1515_v15 = vld [vmem:[%s2159_s2 + $0x30] ss:$8 sps:$4 sm:$0xff]   ;;  %vm776_vm6 = vcmask 1043456  }
  0x10   :  { %245 = vmatprep.subr.bf16.mxu0 %v1486_v9  ;;  %711 = vperm.xlu0 %1472, %v704_v61   ;;  %v1520_v16 = vld [vmem:[%s2159_s2 + $0x44] ss:$8 sps:$4 sm:$0xff]   ;;  %v130_v17 = vor.u32 %v128_v10, %v118_v57  ;;  %v1525_v19 = vld [vmem:[%s2159_s2 + $0x54] ss:$8 sps:$4 sm:$0xff]   ;;  %v1523_v20 = vld [vmem:[%s2159_s2 + $0x50] ss:$8 sps:$4 sm:$0xff]  }
  0x11   :  { %v492_v6 = vrot.slane %v1378_v63, 1  ;;  %v1526_v22 = vld [vmem:[%s2159_s2 + $0x60] ss:$8 sps:$4 sm:$0xff]   ;;  %v1534_v25 = vld [vmem:[%s2159_s2 + $0x84] ss:$8 sps:$4 sm:$0xff]   ;;  %v489_v51 = vrot.slane %v1377_v62, 1 }
  0x12   :  { %726 = vperm.xlu1 %1473, %v707_v7   ;;  %v1532_v26 = vld [vmem:[%s2159_s2 + $0x80] ss:$8 sps:$4 sm:$0xff]   ;;  %v1543_v33 = vld [vmem:[%s2159_s2 + $0x144] ss:$8 sps:$4 sm:$0xff]   ;;  %v1552_v43 = vld [vmem:[%s2159_s2 + $0x170] ss:$8 sps:$4 sm:$0xff]  }
  0x13   :  { %246 = vmatpush1.bf16.msra.mxu0 %v1488_v14  ;;  %v1791_v9 = vsel %vm488_vm2, %v492_v6, %v493_v36  ;;  %v708_v14 = vld [vmem:[%s2161_s1 + $0x20] sm:$0xf]  ;;  %v1544_v36 = vld [vmem:[%s2159_s2 + $0x150] ss:$8 sps:$4 sm:$0xff]   ;;  %v1557_v44 = vld [vmem:[%s2159_s2 + $0x184] ss:$8 sps:$4 sm:$0xff]   ;;  %v674_v6 = vlaneseq }
  0x14   :  { %247 = vmatprep.subr.bf16.mxu0 %v1489_v18  ;;  %716 = vperm.xlu0 %1472, %v705_v2   ;;  %v1518_v18 = vld [vmem:[%s2159_s2 + $0x40] ss:$8 sps:$4 sm:$0xff]   ;;  %v1558_v48 = vld [vmem:[%s2159_s2 + $0x190] ss:$8 sps:$4 sm:$0xff]   ;;  %790 = vst.msk [vmem:[#allocation2 + $0x20] sm:$0x44] %vm789_vm5, %v1600_v1 }
  0x15   :  { %v1535_v29 = vld [vmem:[%s2159_s2 + $0x120] ss:$8 sps:$4 sm:$0xff]   ;;  %v1568_v31 = vld [vmem:[%s2162_s4 + $0x58] sm:$0xff]   ;;  %v675_v7 = vshrl.u32 %v674_v6, 7  ;;  %vm777_vm7 = vcmask 130052   ;;  %vm783_vm9 = vcmask 1041408  }
  0x16   :  { %v28_v34 = vld [vmem:[%s2160_s0 + $0x20] sm:$0x33]  ;;  %v1566_v11 = vld [vmem:[%s2162_s4 + $0x48] sm:$0xff]   ;;  %v1572_v56 = vld [vmem:[%s2162_s4 + $0x78] sm:$0xff]   ;;  %vm784_vm10 = vcmask 128004  }
  0x17   :  { %248 = vmatpush1.bf16.msra.mxu0 %v1491_v21  ;;  %v1528_v21 = vld [vmem:[%s2159_s2 + $0x64] ss:$8 sps:$4 sm:$0xff]   ;;  %v1355_v35 = vcombine.high %v28_v34, %v28_v34  ;;  %v1354_v39 = vcombine.low %v28_v34, %v28_v34  ;;  %v1549_v40 = vld [vmem:[%s2159_s2 + $0x160] ss:$8 sps:$4 sm:$0xff]   ;;  %966 = vmatpush1.bf16.msra.mxu1 %v1566_v11  ;;  %v680_v10 = vsub.s32 1, %v675_v7  ;;  %vm1955_vm8 = vmor %vm777_vm7, %vm776_vm6 }
  0x18   :  { %249 = vmatprep.subr.bf16.mxu0 %v1492_v24  ;;  %731 = vperm.xlu0 %1472, %v708_v14   ;;  %v1531_v24 = vld [vmem:[%s2159_s2 + $0x74] ss:$8 sps:$4 sm:$0xff]   ;;  %v1555_v46 = vld [vmem:[%s2159_s2 + $0x180] ss:$8 sps:$4 sm:$0xff]   ;;  %vm785_vm11 = vmor %vm784_vm10, %vm783_vm9 }
  0x19   :  { %967 = vmatprep.subr.bf16.mxu1 %v1600_v1  ;;  %v1573_v57 = vld [vmem:[%s2162_s4 + $0x80] sm:$0xff]   ;;  %v1574_v58 = vld [vmem:[%s2162_s4 + $0x88] sm:$0xff]  }
  0x1b   :  { %250 = vmatpush1.bf16.msra.mxu0 %v1494_v27  ;;  %v1537_v27 = vld [vmem:[%s2159_s2 + $0x124] ss:$8 sps:$4 sm:$0xff]  }
  0x1c   :  { %251 = vmatprep.subr.bf16.mxu0 %v1495_v30  ;;  %v1540_v30 = vld [vmem:[%s2159_s2 + $0x134] ss:$8 sps:$4 sm:$0xff]  }
  0x1f   :  { %252 = vmatpush1.bf16.msra.mxu0 %v1497_v32  ;;  %v1538_v32 = vld [vmem:[%s2159_s2 + $0x130] ss:$8 sps:$4 sm:$0xff]  }
  0x20   :  { %253 = vmatprep.subr.bf16.mxu0 %v1498_v38  ;;  %v1551_v38 = vld [vmem:[%s2159_s2 + $0x164] ss:$8 sps:$4 sm:$0xff]  }
  0x23   :  { %254 = vmatpush1.bf16.msra.mxu0 %v1500_v42  ;;  %v1554_v42 = vld [vmem:[%s2159_s2 + $0x174] ss:$8 sps:$4 sm:$0xff]  }
  0x24   :  { %403 = vmatprep.subr.bf16.mxu0 %v1506_v47  ;;  %v1560_v47 = vld [vmem:[%s2159_s2 + $0x194] ss:$8 sps:$4 sm:$0xff]  }
  0x26   :  { %270 = vmatmul.mubr.bf16.vlgmr.msra.gmra.mrb[0].mxu0 %v99_v50  ;;  %v1561_v50 = vld [vmem:[%s2159_s2 + $0x1a0] ss:$8 sps:$4 sm:$0xff]  }
  0x27   :  { %404 = vmatpush1.bf16.msra.mxu0 %v1504_v49  ;;  %1352 = vmatprep.mubr.msk.bf16.mxu0 %vm227_vm1, %v127_v54  ;;  %v1563_v49 = vld [vmem:[%s2159_s2 + $0x1a4] ss:$8 sps:$4 sm:$0xff]   ;;  %v495_v54 = vrot.slane %v1739_v45, 1  ;;  %v1571_v45 = vld [vmem:[%s2162_s4 + $0x70] sm:$0xff]  }
  0x28   :  { %405 = vmatprep.subr.bf16.mxu0 %v1511_v53  ;;  %v491_v53 = vsel %vm488_vm2, %v489_v51, %v490_v52 }
  0x2b   :  { %406 = vmatpush1.bf16.msra.mxu0 %v1509_v55  ;;  %v496_v55 = vsel %vm488_vm2, %v490_v52, %v495_v54 }
  0x2c   :  { %407 = vmatprep.subr.bf16.mxu0 %v1514_v59 }
  0x2e   :  { %280 = vmatmul.mubr.bf16.gmra.mrb[4].mxu0 %v119_v4 }
  0x2f   :  { %408 = vmatpush1.bf16.msra.mxu0 %v1512_v3  ;;  %1353 = vmatprep.mubr.msk.bf16.mxu0 %vm227_vm1, %v133_v5 }
  0x30   :  { %409 = vmatprep.subr.bf16.mxu0 %v1517_v8  ;;  %v676_v8 = vsub.s32 0, %v675_v7 }
  0x33   :  { %410 = vmatpush1.bf16.msra.mxu0 %v1515_v15 }
  0x34   :  { %411 = vmatprep.subr.bf16.mxu0 %v1520_v16 }
  0x36   :  { %290 = vmatmul.mubr.bf16.gmra.mrb[8].mxu0 %v130_v17 }
  0x37   :  { %412 = vmatpush1.bf16.msra.mxu0 %v1518_v18  ;;  %1374 = vmatprep.mubr.msk.bf16.mxu0 %vm227_vm1, %v1675_v12  ;;  %v1529_v12 = vld [vmem:[%s2159_s2 + $0x70] ss:$8 sps:$4 sm:$0xff]  }
  0x38   :  { %413 = vmatprep.subr.bf16.mxu0 %v1525_v19 }
  0x3b   :  { %414 = vmatpush1.bf16.msra.mxu0 %v1523_v20 }
  0x3c   :  { %415 = vmatprep.subr.bf16.mxu0 %v1528_v21 }
  0x3f   :  { %416 = vmatpush1.bf16.msra.mxu0 %v1526_v22 }
  0x40   :  { %417 = vmatprep.subr.bf16.mxu0 %v1531_v24 }
  0x43   :  { %418 = vmatpush1.bf16.msra.mxu0 %v1529_v12 }
  0x44   :  { %419 = vmatprep.subr.bf16.mxu0 %v1534_v25 }
  0x47   :  { %420 = vmatpush1.bf16.msra.mxu0 %v1532_v26 }
  0x48   :  { %601 = vmatprep.subr.bf16.mxu0 %v1537_v27 }
  0x4a   :  { %436 = vmatmul.mubr.bf16.vlgmr.msra.gmra.mrb[0].mxu0 %v1695_v23  ;;  %v1541_v23 = vld [vmem:[%s2159_s2 + $0x140] ss:$8 sps:$4 sm:$0xff]  }
  0x4b   :  { %602 = vmatpush1.bf16.msra.mxu0 %v1535_v29  ;;  %1375 = vmatprep.mubr.msk.bf16.mxu0 %vm227_vm1, %v1680_v13  ;;  %v1546_v13 = vld [vmem:[%s2159_s2 + $0x154] ss:$8 sps:$4 sm:$0xff]  }
  0x4c   :  { %603 = vmatprep.subr.bf16.mxu0 %v1540_v30 }
  0x4f   :  { %604 = vmatpush1.bf16.msra.mxu0 %v1538_v32 }
  0x50   :  { %605 = vmatprep.subr.bf16.mxu0 %v1543_v33 }
  0x52   :  { %446 = vmatmul.mubr.bf16.gmra.mrb[4].mxu0 %v1711_v28  ;;  %v1567_v28 = vld [vmem:[%s2162_s4 + $0x50] sm:$0xff]  }
  0x53   :  { %606 = vmatpush1.bf16.msra.mxu0 %v1541_v23  ;;  %1376 = vmatprep.mubr.msk.bf16.mxu0 %vm227_vm1, %v1355_v35 }
  0x54   :  { %607 = vmatprep.subr.bf16.mxu0 %v1546_v13  ;;  %968 = vmatpush1.bf16.msra.mxu1 %v1567_v28 }
  0x55   :  { %969 = vmatprep.subr.bf16.mxu1 %v1600_v1 }
  0x57   :  { %608 = vmatpush1.bf16.msra.mxu0 %v1544_v36 }
  0x58   :  { %609 = vmatprep.subr.bf16.mxu0 %v1551_v38  ;;  %970 = vmatpush1.bf16.msra.mxu1 %v1568_v31 }
  0x59   :  { %971 = vmatprep.subr.bf16.mxu1 %v1600_v1 }
  0x5a   :  { %456 = vmatmul.mubr.bf16.gmra.mrb[12].mxu0 %v1354_v39 }
  0x5b   :  { %610 = vmatpush1.bf16.msra.mxu0 %v1549_v40  ;;  %1397 = vmatprep.mubr.msk.bf16.mxu0 %vm227_vm1, %v1791_v9  ;;  %v672_v9 = vld [vmem:[%s2163_s3] sm:$0x3] }
  0x5c   :  { %611 = vmatprep.subr.bf16.mxu0 %v1554_v42  ;;  %v677_v14 = vrot.slane %v672_v9, %v676_v8  ;;  %v681_v15 = vrot.slane %v672_v9, %v680_v10 }
  0x5f   :  { %612 = vmatpush1.bf16.msra.mxu0 %v1552_v43 }
  0x60   :  { %613 = vmatprep.subr.bf16.mxu0 %v1557_v44 }
  0x63   :  { %614 = vmatpush1.bf16.msra.mxu0 %v1555_v46 }
  0x64   :  { %615 = vmatprep.subr.bf16.mxu0 %v1560_v47 }
  0x67   :  { %616 = vmatpush1.bf16.msra.mxu0 %v1558_v48 }
  0x68   :  { %617 = vmatprep.subr.bf16.mxu0 %v1563_v49 }
  0x6b   :  { %618 = vmatpush1.bf16.msra.mxu0 %v1561_v50 }
  0x6e   :  { %634 = vmatmul.mubr.bf16.vlgmr.msra.gmra.mrb[0].mxu0 %v491_v53 }
  0x6f   :  { %1398 = vmatprep.mubr.msk.bf16.mxu0 %vm227_vm1, %v1734_v41  ;;  %v1570_v41 = vld [vmem:[%s2162_s4 + $0x68] sm:$0xff]  }
  0x76   :  { %644 = vmatmul.mubr.bf16.gmra.mrb[4].mxu0 %v496_v55 }
  0x77   :  { %1399 = vmatprep.mubr.msk.bf16.mxu0 %vm227_vm1, %v497_v37  ;;  %v1569_v37 = vld [vmem:[%s2162_s4 + $0x60] sm:$0xff]  }
  0x78   :  { %972 = vmatpush1.bf16.msra.mxu1 %v1569_v37 }
  0x79   :  { %973 = vmatprep.subr.bf16.mxu1 %v1600_v1 }
  0x7c   :  { %974 = vmatpush1.bf16.msra.mxu1 %v1570_v41 }
  0x7d   :  { %975 = vmatprep.subr.bf16.mxu1 %v1600_v1 }
  0x7e   :  { %654 = vmatmul.mubr.bf16.gmra.mrb[16].mxu0 %v495_v54 }
  0x80   :  { %976 = vmatpush1.bf16.msra.mxu1 %v1571_v45 }
  0x81   :  { %977 = vmatprep.subr.bf16.mxu1 %v1600_v1 }
  0x84   :  { %978 = vmatpush1.bf16.msra.mxu1 %v1572_v56 }
  0x85   :  { %979 = vmatprep.subr.bf16.mxu1 %v1600_v1 }
  0x88   :  { %980 = vmatpush1.bf16.msra.mxu1 %v1573_v57 }
  0x89   :  { %981 = vmatprep.subr.bf16.mxu1 %v1600_v1 }
  0x8c   :  { %982 = vmatpush1.bf16.msra.mxu1 %v1574_v58 }
  0x8d   :  { %1084 = vmatprep.subr.bf16.mxu1 %v1600_v1  ;;  %v722_v36 = vpop.permute.xlu1 %721 }
  0x8f   :  { %v712_v17 = vpop.permute.xlu0 %711 }
  0x91   :  { %v727_v11 = vpop.permute.xlu1 %726 }
  0x93   :  { %v717_v33 = vpop.permute.xlu0 %716 }
  0x97   :  { %v732_v9 = vpop.permute.xlu0 %731 }
 0x109   :  { %v291_v59 = vpop.f32.mrb[8].mxu0 }
 0x10a   :  { %v293_v60 = vpop.f32.mrb[9].mxu0 }
 0x10b   :  { %v295_v61 = vpop.f32.mrb[10].mxu0 }
 0x10c   :  { %v296_v62 = vpop.f32.mrb[11].mxu0 }
 0x12d   :  { %v457_v63 = vpop.f32.mrb[12].mxu0 }
 0x12e   :  { %v458_v0 = vadd.f32 %v457_v63, %v291_v59  ;;  %v459_v2 = vpop.f32.mrb[13].mxu0 }
 0x12f   :  { %v1946_v3 = vadd.f32 %v459_v2, %v293_v60  ;;  %v461_v4 = vpop.f32.mrb[14].mxu0 }
 0x130   :  { %v462_v5 = vpop.f32.mrb[15].mxu0 }
 0x141   :  { %v635_v16 = vpop.f32.mrb[0].mxu0 }
 0x142   :  { %v684_v18 = vadd.f32 %v677_v14, %v635_v16  ;;  %v637_v19 = vpop.f32.mrb[1].mxu0 }
 0x143   :  { %v685_v20 = vadd.f32 %v681_v15, %v637_v19  ;;  %v639_v21 = vpop.f32.mrb[2].mxu0 }
 0x144   :  { %v694_v22 = vmax.f32 %v684_v18, 0.0  ;;  %v686_v24 = vadd.f32 %v677_v14, %v639_v21  ;;  %v641_v12 = vpop.f32.mrb[3].mxu0 }
 0x145   :  { %v695_v25 = vmax.f32 %v685_v20, 0.0  ;;  %v687_v26 = vadd.f32 %v681_v15, %v641_v12 }
 0x146   :  { %v1951_v27 = vmul.f32 %v712_v17, %v694_v22  ;;  %v696_v29 = vmax.f32 %v686_v24, 0.0 }
 0x147   :  { %v1953_v30 = vmul.f32 %v712_v17, %v695_v25  ;;  %v697_v32 = vmax.f32 %v687_v26, 0.0 }
 0x148   :  { %v1959_v23 = vmul.f32 %v717_v33, %v696_v29 }
 0x149   :  { %v1450_v35 = vpack.c.bf16 %v1953_v30, %v1951_v27  ;;  %v1963_v13 = vmul.f32 %v717_v33, %v697_v32  ;;  %v645_v38 = vpop.f32.mrb[4].mxu0 }
 0x14a   :  { %v744_v39 = vpack.c.bf16 %v1959_v23, %v1951_v27  ;;  %v688_v40 = vadd.f32 %v677_v14, %v645_v38  ;;  %v647_v42 = vpop.f32.mrb[5].mxu0 }
 0x14b   :  { %779 = vst.msk [vmem:[#allocation2] sm:$0xff] %vm1955_vm8, %v1450_v35  ;;  %v745_v43 = vpack.c.bf16 %v1963_v13, %v1953_v30  ;;  %v1451_v44 = vpack.c.bf16 %v1963_v13, %v1959_v23  ;;  %v689_v46 = vadd.f32 %v681_v15, %v647_v42  ;;  %v649_v47 = vpop.f32.mrb[6].mxu0  ;;  %v1589_v30 = vld [vmem:[%s2162_s4 + $0x38] sm:$0xff]   ;;  %v1590_v13 = vld [vmem:[%s2162_s4 + $0x40] sm:$0xff]   ;;  %v1594_v23 = vld [vmem:[%s2162_s4 + $0xa8] sm:$0xff]  }
 0x14c   :  { %v698_v48 = vmax.f32 %v688_v40, 0.0  ;;  %v690_v49 = vadd.f32 %v677_v14, %v649_v47  ;;  %v651_v50 = vpop.f32.mrb[7].mxu0  ;;  %v1580_v40 = vld [vmem:[%s2162_s4] sm:$0xff]  }
 0x14d   :  { %780 = vst.msk [vmem:[#allocation2 + $0x8] sm:$0xff] %vm1955_vm8, %v1451_v44  ;;  %v699_v51 = vmax.f32 %v689_v46, 0.0  ;;  %v691_v52 = vadd.f32 %v681_v15, %v651_v50 }
 0x14e   :  { %v1975_v53 = vmul.f32 %v722_v36, %v698_v48  ;;  %v700_v54 = vmax.f32 %v690_v49, 0.0  ;;  %v1581_v48 = vld [vmem:[%s2162_s4 + $0x8] sm:$0xff]  }
 0x14f   :  { %v1977_v55 = vmul.f32 %v722_v36, %v699_v51  ;;  %v701_v28 = vmax.f32 %v691_v52, 0.0 }
 0x150   :  { %v1979_v31 = vmul.f32 %v727_v11, %v700_v54 }
 0x151   :  { %v1452_v37 = vpack.c.bf16 %v1977_v55, %v1975_v53  ;;  %v1983_v41 = vmul.f32 %v727_v11, %v701_v28  ;;  %v655_v45 = vpop.f32.mrb[16].mxu0 }
 0x152   :  { %v746_v56 = vpack.c.bf16 %v1979_v31, %v1975_v53  ;;  %v670_v57 = vadd.f32 %v655_v45, %v458_v0  ;;  %v657_v58 = vpop.f32.mrb[17].mxu0  ;;  %v809_v4 = vld [vmem:[#allocation2] sm:$0xff]  ;;  %v1595_v53 = vld [vmem:[%s2162_s4 + $0xb0] sm:$0xff]  }
 0x153   :  { %781 = vst.msk [vmem:[#allocation2 + $0x10] sm:$0xff] %vm1955_vm8, %v1452_v37  ;;  %v747_v59 = vpack.c.bf16 %v1983_v41, %v1977_v55  ;;  %v1453_v60 = vpack.c.bf16 %v1983_v41, %v1979_v31  ;;  %v671_v61 = vadd.f32 %v657_v58, %v1946_v3  ;;  %v659_v62 = vpop.f32.mrb[18].mxu0  ;;  %v2004_v18 = vld [vmem:[#allocation2] sm:$0xee] }
 0x154   :  { %v692_v63 = vadd.f32 %v677_v14, %v670_v57  ;;  %v660_v2 = vpop.f32.mrb[19].mxu0  ;;  %v1994_v5 = vld [vmem:[#allocation2 + $0x8] sm:$0xff] }
 0x155   :  { %782 = vst.msk [vmem:[#allocation2 + $0x18] sm:$0xff] %vm1955_vm8, %v1453_v60  ;;  %v693_v0 = vadd.f32 %v681_v15, %v671_v61  ;;  %v1406_v6 = vcombine.high %v809_v4, %v1994_v5  ;;  %v1405_v7 = vcombine.low %v809_v4, %v1994_v5  ;;  %v1435_v20 = vcombine.low %v2004_v18, %v1994_v5  ;;  %v1584_v61 = vld [vmem:[%s2162_s4 + $0x10] sm:$0xff]  }
 0x156   :  { %v702_v8 = vmax.f32 %v692_v63, 0.0 }
 0x157   :  { %v703_v10 = vmax.f32 %v693_v0, 0.0  ;;  %v868_v3 = vshll.u32 %v1406_v6, 16  ;;  %v856_v14 = vshll.u32 %v1405_v7, 16  ;;  %v866_v12 = vshrl.u32 %v1406_v6, 16  ;;  %v1585_v0 = vld [vmem:[%s2162_s4 + $0x18] sm:$0xff]  }
 0x158   :  { %v2000_v16 = vmul.f32 %v732_v9, %v702_v8  ;;  %v854_v26 = vshrl.u32 %v1405_v7, 16  ;;  %v1164_v32 = vrot.slane %v1435_v20, 1  ;;  %v1586_v7 = vld [vmem:[%s2162_s4 + $0x20] sm:$0xff]  }
 0x159   :  { %v2002_v17 = vmul.f32 %v732_v9, %v703_v10  ;;  %v870_v19 = vrot.slane %v868_v3, 1  ;;  %v858_v24 = vrot.slane %v856_v14, 1  ;;  %v1587_v9 = vld [vmem:[%s2162_s4 + $0x28] sm:$0xff]   ;;  %v1588_v10 = vld [vmem:[%s2162_s4 + $0x30] sm:$0xff]   ;;  %v1592_v3 = vld [vmem:[%s2162_s4 + $0x98] sm:$0xff]  }
 0x15a   :  { %v1593_v14 = vld [vmem:[%s2162_s4 + $0xa0] sm:$0xff]   ;;  %v748_v31 = vpack.c.bf16 %v2000_v16, %v2000_v16 }
 0x15b   :  { %v1454_v15 = vpack.c.bf16 %v2002_v17, %v2000_v16  ;;  %v871_v34 = vor.u32 %v870_v19, %v866_v12  ;;  %v859_v36 = vor.u32 %v858_v24, %v854_v26  ;;  %v749_v27 = vpack.c.bf16 %v2002_v17, %v2002_v17  ;;  %v1598_v16 = vld [vmem:[%s2162_s4 + $0xc8] sm:$0xff]   ;;  %v1599_v17 = vld [vmem:[%s2162_s4 + $0xd0] sm:$0xff]  }
 0x15c   :  { %v2010_v21 = vld [vmem:[#allocation2 + $0x14] ss:$8 sps:$4 sm:$0xff]   ;;  %v1579_v22 = vld [vmem:[#allocation2 + $0x10] ss:$8 sps:$4 sm:$0xff]  }
 0x15d   :  { %786 = vst.msk [vmem:[#allocation2 + $0x20] sm:$0x33] %vm785_vm11, %v1454_v15  ;;  %v873_v25 = vshll.u32 %v2010_v21, 16  ;;  %v861_v29 = vshll.u32 %v1579_v22, 16  ;;  %v1165_v33 = vrot.slane %v1579_v22, 1  ;;  %v885_v51 = vshrl.u32 %v2010_v21, 16 }
 0x15e   :  { %v877_v54 = vshrl.u32 %v1579_v22, 16  ;;  %v1168_v55 = vrot.slane %v2010_v21, 1 }
 0x15f   :  { %v875_v35 = vrot.slane %v873_v25, 1  ;;  %v863_v38 = vrot.slane %v861_v29, 1  ;;  %v2017_v42 = vsel %vm488_vm2, %v1164_v32, %v1165_v33 }
 0x161   :  { %v876_v44 = vsel %vm87_vm0, %v871_v34, %v875_v35  ;;  %v864_v46 = vsel %vm87_vm0, %v859_v36, %v863_v38  ;;  %v887_v28 = vor.u32 %v885_v51, %v875_v35  ;;  %v879_v57 = vor.u32 %v877_v54, %v863_v38 }
 0x162   :  { %1420 = vmatprep.mubr.msk.bf16.mxu1 %vm227_vm1, %v876_v44 }
 0x163   :  { %998 = vmatmul.mubr.bf16.vlgmr.msra.gmra.mrb[0].mxu1 %v864_v46 }
 0x164   :  { %v813_v47 = vld [vmem:[#allocation2 + $0x20] sm:$0x77]  ;;  %1085 = vmatpush1.bf16.msra.mxu1 %v1580_v40 }
 0x165   :  { %v2025_v49 = vcombine.high %v813_v47, %v813_v47  ;;  %v2027_v50 = vcombine.low %v813_v47, %v813_v47  ;;  %1086 = vmatprep.subr.bf16.mxu1 %v1600_v1 }
 0x167   :  { %v889_v52 = vshll.u32 %v2025_v49, 16  ;;  %v881_v11 = vshll.u32 %v2027_v50, 16  ;;  %v1170_v37 = vrot.slane %v2027_v50, 1  ;;  %v896_v60 = vshrl.u32 %v2025_v49, 16 }
 0x168   :  { %1087 = vmatpush1.bf16.msra.mxu1 %v1581_v48  ;;  %v893_v6 = vshrl.u32 %v2027_v50, 16 }
 0x169   :  { %v891_v45 = vrot.slane %v889_v52, 1  ;;  %v883_v58 = vrot.slane %v881_v11, 1  ;;  %1088 = vmatprep.subr.bf16.mxu1 %v1600_v1  ;;  %v2042_v62 = vsel %vm488_vm2, %v1165_v33, %v1170_v37 }
 0x16b   :  { %v892_v63 = vsel %vm87_vm0, %v887_v28, %v891_v45  ;;  %v884_v2 = vsel %vm87_vm0, %v879_v57, %v883_v58  ;;  %v898_v4 = vor.u32 %v896_v60, %v891_v45  ;;  %v895_v8 = vor.u32 %v893_v6, %v883_v58  ;;  %v1449_v45 = vld [vmem:[%s2164_s5] ss:$0 sm:$0xff] }
 0x16c   :  { %1421 = vmatprep.mubr.msk.bf16.mxu1 %vm227_vm1, %v892_v63  ;;  %1089 = vmatpush1.bf16.msra.mxu1 %v1584_v61 }
 0x16d   :  { %1006 = vmatmul.mubr.bf16.gmra.mrb[4].mxu1 %v884_v2  ;;  %1090 = vmatprep.subr.bf16.mxu1 %v1600_v1 }
 0x16e   :  { %1422 = vmatprep.mubr.msk.bf16.mxu1 %vm227_vm1, %v898_v4 }
 0x170   :  { %1091 = vmatpush1.bf16.msra.mxu1 %v1585_v0 }
 0x171   :  { %1092 = vmatprep.subr.bf16.mxu1 %v1600_v1 }
 0x174   :  { %1093 = vmatpush1.bf16.msra.mxu1 %v1586_v7 }
 0x175   :  { %1014 = vmatmul.mubr.bf16.gmra.mrb[8].mxu1 %v895_v8  ;;  %1094 = vmatprep.subr.bf16.mxu1 %v1600_v1 }
 0x176   :  { %1432 = vmatprep.mubr.msk.bf16.mxu1 %vm227_vm1, %v745_v43  ;;  %v1591_v43 = vld [vmem:[%s2162_s4 + $0x90] sm:$0xff]  }
 0x178   :  { %1095 = vmatpush1.bf16.msra.mxu1 %v1587_v9 }
 0x179   :  { %1096 = vmatprep.subr.bf16.mxu1 %v1600_v1 }
 0x17c   :  { %1097 = vmatpush1.bf16.msra.mxu1 %v1588_v10 }
 0x17d   :  { %1098 = vmatprep.subr.bf16.mxu1 %v1600_v1 }
 0x180   :  { %1099 = vmatpush1.bf16.msra.mxu1 %v1589_v30 }
 0x181   :  { %1100 = vmatprep.subr.bf16.mxu1 %v1600_v1 }
 0x184   :  { %1101 = vmatpush1.bf16.msra.mxu1 %v1590_v13 }
 0x185   :  { %1240 = vmatprep.subr.bf16.mxu1 %v1600_v1 }
 0x187   :  { %1117 = vmatmul.mubr.bf16.vlgmr.msra.gmra.mrb[12].mxu1 %v744_v39  ;;  %v1436_v39 = vcombine.high %v2004_v18, %v1994_v5  ;;  %v1597_v5 = vld [vmem:[%s2162_s4 + $0xc0] sm:$0xff]   ;;  %v1172_v18 = vrot.slane %v2025_v49, 1 }
 0x188   :  { %1433 = vmatprep.mubr.msk.bf16.mxu1 %vm227_vm1, %v747_v59  ;;  %1241 = vmatpush1.bf16.msra.mxu1 %v1591_v43  ;;  %v1596_v59 = vld [vmem:[%s2162_s4 + $0xb8] sm:$0xff]  }
 0x189   :  { %1242 = vmatprep.subr.bf16.mxu1 %v1600_v1  ;;  %v1167_v41 = vrot.slane %v1436_v39, 1  ;;  %v1173_v15 = vsel %vm488_vm2, %v1168_v55, %v1172_v18 }
 0x18c   :  { %1243 = vmatpush1.bf16.msra.mxu1 %v1592_v3 }
 0x18d   :  { %1244 = vmatprep.subr.bf16.mxu1 %v1600_v1 }
 0x18f   :  { %1125 = vmatmul.mubr.bf16.gmra.mrb[16].mxu1 %v746_v56  ;;  %v1169_v56 = vsel %vm488_vm2, %v1167_v41, %v1168_v55 }
 0x190   :  { %1434 = vmatprep.mubr.msk.bf16.mxu1 %vm227_vm1, %v749_v27  ;;  %1245 = vmatpush1.bf16.msra.mxu1 %v1593_v14 }
 0x191   :  { %1246 = vmatprep.subr.bf16.mxu1 %v1600_v1 }
 0x194   :  { %1247 = vmatpush1.bf16.msra.mxu1 %v1594_v23 }
 0x195   :  { %1248 = vmatprep.subr.bf16.mxu1 %v1600_v1 }
 0x197   :  { %1133 = vmatmul.mubr.bf16.gmra.mrb[20].mxu1 %v748_v31 }
 0x198   :  { %1249 = vmatpush1.bf16.msra.mxu1 %v1595_v53  ;;  %1446 = vmatprep.mubr.msk.bf16.mxu1 %vm227_vm1, %v1169_v56 }
 0x199   :  { %1250 = vmatprep.subr.bf16.mxu1 %v1600_v1 }
 0x19c   :  { %1251 = vmatpush1.bf16.msra.mxu1 %v1596_v59 }
 0x19d   :  { %1252 = vmatprep.subr.bf16.mxu1 %v1600_v1 }
 0x1a0   :  { %1253 = vmatpush1.bf16.msra.mxu1 %v1597_v5 }
 0x1a1   :  { %1254 = vmatprep.subr.bf16.mxu1 %v1600_v1 }
 0x1a4   :  { %1255 = vmatpush1.bf16.msra.mxu1 %v1598_v16 }
 0x1a5   :  { %1256 = vmatprep.subr.bf16.mxu1 %v1600_v1 }
 0x1a8   :  { %1257 = vmatpush1.bf16.msra.mxu1 %v1599_v17 }
 0x1ab   :  { %1273 = vmatmul.mubr.bf16.vlgmr.msra.gmra.mrb[24].mxu1 %v2017_v42 }
 0x1ac   :  { %1447 = vmatprep.mubr.msk.bf16.mxu1 %vm227_vm1, %v1173_v15 }
 0x1b3   :  { %1281 = vmatmul.mubr.bf16.gmra.mrb[28].mxu1 %v2042_v62 }
 0x1b4   :  { %1448 = vmatprep.mubr.msk.bf16.mxu1 %vm227_vm1, %v1172_v18 }
 0x1bb   :  { %1289 = vmatmul.mubr.bf16.gmra.mrb[32].mxu1 %v1170_v37 }
 0x236   :  { %v999_v19 = vpop.f32.mrb[0].mxu1 }
 0x237   :  { %v1001_v20 = vpop.f32.mrb[1].mxu1 }
 0x238   :  { %v1002_v21 = vpop.f32.mrb[2].mxu1 }
 0x239   :  { %v1004_v1 = vpop.f32.mrb[3].mxu1 }
 0x240   :  { %v1007_v22 = vpop.f32.mrb[4].mxu1 }
 0x241   :  { %v1009_v24 = vpop.f32.mrb[5].mxu1 }
 0x242   :  { %v1010_v12 = vpop.f32.mrb[6].mxu1 }
 0x243   :  { %v1012_v25 = vpop.f32.mrb[7].mxu1 }
 0x248   :  { %v1015_v26 = vpop.f32.mrb[8].mxu1 }
 0x249   :  { %v1017_v29 = vpop.f32.mrb[9].mxu1 }
 0x24a   :  { %v1018_v32 = vpop.f32.mrb[10].mxu1 }
 0x24b   :  { %v1019_v33 = vpop.f32.mrb[11].mxu1 }
 0x25a   :  { %v1118_v34 = vpop.f32.mrb[12].mxu1 }
 0x25b   :  { %v1119_v35 = vadd.f32 %v1118_v34, %v999_v19  ;;  %v1120_v36 = vpop.f32.mrb[13].mxu1 }
 0x25c   :  { %v1121_v38 = vpop.f32.mrb[14].mxu1 }
 0x25d   :  { %v1122_v40 = vadd.f32 %v1121_v38, %v1002_v21  ;;  %v1123_v42 = vpop.f32.mrb[15].mxu1 }
 0x262   :  { %v1126_v44 = vpop.f32.mrb[16].mxu1 }
 0x263   :  { %v1127_v46 = vadd.f32 %v1126_v44, %v1007_v22  ;;  %v1128_v47 = vpop.f32.mrb[17].mxu1 }
 0x264   :  { %v1129_v48 = vpop.f32.mrb[18].mxu1 }
 0x265   :  { %v1130_v49 = vadd.f32 %v1129_v48, %v1010_v12  ;;  %v1131_v50 = vpop.f32.mrb[19].mxu1 }
 0x26a   :  { %v1134_v51 = vpop.f32.mrb[20].mxu1 }
 0x26b   :  { %v1135_v52 = vadd.f32 %v1134_v51, %v1015_v26  ;;  %v1136_v54 = vpop.f32.mrb[21].mxu1 }
 0x26c   :  { %v1137_v11 = vpop.f32.mrb[22].mxu1 }
 0x26d   :  { %v1138_v28 = vpop.f32.mrb[23].mxu1 }
 0x27e   :  { %v1274_v37 = vpop.f32.mrb[24].mxu1 }
 0x27f   :  { %v1296_v57 = vadd.f32 %v1274_v37, %v1119_v35  ;;  %v1276_v58 = vpop.f32.mrb[25].mxu1 }
 0x280   :  { %v1277_v60 = vpop.f32.mrb[26].mxu1 }
 0x281   :  { %v1308_v61 = vadd.f32 %v1449_v45, %v1296_v57  ;;  %v1297_v62 = vadd.f32 %v1277_v60, %v1122_v40  ;;  %v1279_v63 = vpop.f32.mrb[27].mxu1 }
 0x283   :  { %v1313_v2 = vmax.f32 %v1308_v61, 0.0  ;;  %v1309_v4 = vadd.f32 %v1449_v45, %v1297_v62 }
 0x285   :  { %1318 = vst [vmem:[%s2165_s6] sm:$0xff] %v1313_v2  ;;  %v1314_v0 = vmax.f32 %v1309_v4, 0.0 }
 0x286   :  { %v1282_v6 = vpop.f32.mrb[28].mxu1 }
 0x287   :  { %1319 = vst [vmem:[%s2165_s6 + $0x8] sm:$0xff] %v1314_v0  ;;  %v1298_v7 = vadd.f32 %v1282_v6, %v1127_v46  ;;  %v1284_v8 = vpop.f32.mrb[29].mxu1 }
 0x288   :  { %v1285_v9 = vpop.f32.mrb[30].mxu1 }
 0x289   :  { %v1310_v10 = vadd.f32 %v1449_v45, %v1298_v7  ;;  %v1299_v30 = vadd.f32 %v1285_v9, %v1130_v49  ;;  %v1287_v13 = vpop.f32.mrb[31].mxu1 }
 0x28b   :  { %v1315_v43 = vmax.f32 %v1310_v10, 0.0  ;;  %v1311_v3 = vadd.f32 %v1449_v45, %v1299_v30 }
 0x28d   :  { %1320 = vst [vmem:[%s2165_s6 + $0x10] sm:$0xff] %v1315_v43  ;;  %v1316_v14 = vmax.f32 %v1311_v3, 0.0 }
 0x28e   :  { %v1290_v27 = vpop.f32.mrb[32].mxu1 }
 0x28f   :  { %1321 = vst [vmem:[%s2165_s6 + $0x18] sm:$0xff] %v1316_v14  ;;  %v1300_v23 = vadd.f32 %v1290_v27, %v1135_v52  ;;  %v1292_v39 = vpop.f32.mrb[33].mxu1 }
 0x290   :  { %v1293_v55 = vpop.f32.mrb[34].mxu1 }
 0x291   :  { %v1312_v53 = vadd.f32 %v1449_v45, %v1300_v23  ;;  %v1294_v31 = vpop.f32.mrb[35].mxu1 }
 0x293   :  { %v1317_v41 = vmax.f32 %v1312_v53, 0.0 }
 0x295   :  { %1322 = vst [vmem:[%s2165_s6 + $0x20] sm:$0xf] %v1317_v41 }

</bundles_post_ra>
